<compile_context>
chip_gen: v5e
topology: v5e:2x2
jax: 0.10.0
libtpu: 0.0.40
codegen_flags: <defaults>
</compile_context>

<pallas_src>
import functools

import jax
import jax.numpy as jnp
from jax.experimental import pallas as pl
from jax.experimental.pallas import tpu as pltpu


# ---- synthetic env spec (WordleEnv2 stand-in, deterministic) ----------------
OBS_DIM = 32                          # env.observation_space.shape[0]
ACTION_NVEC = (26, 26, 26, 26, 26)    # env.action_space.nvec (5 letters, a-z)
HIDDEN = 64
N_TOTAL = sum(ACTION_NVEC)            # 130 concatenated logit columns

TB_MAX = 2048                         # max rows per grid step (amortize overhead)
SINGLE_TILE_MAX = 1024                # below this, one grid step is cheapest


def _round_up(n, m):
    return ((n + m - 1) // m) * m


def _batch_tiling(batch):
    """Return (tile_rows, padded_batch) with padded_batch % tile_rows == 0."""
    bp = _round_up(max(batch, 1), 8)
    if bp <= SINGLE_TILE_MAX:
        return bp, bp                 # small batch: single grid step
    # Large batch: even grid length (both TCs on v7x), tile <= TB_MAX,
    # batch padding bounded to < 8 dead rows per tile.
    n_tiles = max(2, -(-bp // TB_MAX))
    if n_tiles % 2:
        n_tiles += 1
    tile = _round_up(-(-bp // n_tiles), 8)
    return tile, tile * n_tiles


def policy_kernel(x_ref, w1_ref, b1_ref, w2_ref, b2_ref, wh_ref, bh_ref, out_ref):
    # h1 = relu(x @ W1 + b1)          (TB, 32) @ (32, 64)
    h = jnp.dot(x_ref[...], w1_ref[...], preferred_element_type=jnp.float32)
    h = jnp.maximum(h + b1_ref[...], 0.0)
    # h2 = relu(h1 @ W2 + b2)         (TB, 64) @ (64, 64)
    h = jnp.dot(h, w2_ref[...], preferred_element_type=jnp.float32)
    h = jnp.maximum(h + b2_ref[...], 0.0)
    # concatenated head logits        (TB, 64) @ (64, 130)
    o = jnp.dot(h, wh_ref[...], preferred_element_type=jnp.float32)
    out_ref[...] = o + bh_ref[...]


@jax.jit
def policy_forward(x, params):
    """Fused policy forward pass; returns the per-head list of logits."""
    w1, b1, w2, b2, wh, bh = params
    B = x.shape[0]

    TB, Bp = _batch_tiling(B)
    x_p = x.astype(jnp.float32)
    if Bp != B:
        x_p = jnp.pad(x_p, ((0, Bp - B), (0, 0)))   # batch-only padding

    # weights/biases: whole array, same block every step -> VMEM-resident
    resident = lambda shape: pl.BlockSpec(shape, lambda i: (0, 0))

    out = pl.pallas_call(
        policy_kernel,
        out_shape=jax.ShapeDtypeStruct((Bp, N_TOTAL), jnp.float32),
        grid=(Bp // TB,),
        in_specs=[
            pl.BlockSpec((TB, OBS_DIM), lambda i: (i, 0)),   # x tile, pipelined
            resident(w1.shape), resident(b1.shape),
            resident(w2.shape), resident(b2.shape),
            resident(wh.shape), resident(bh.shape),
        ],
        out_specs=pl.BlockSpec((TB, N_TOTAL), lambda i: (i, 0)),
        compiler_params=pltpu.CompilerParams(
            dimension_semantics=("parallel",),               # 2 TCs on v7x
        ),
    )(x_p, w1, b1, w2, b2, wh, bh)

    if Bp != B:
        out = out[:B]                 # pure batch crop (no lane crop needed)

    # split concatenated logits back into the per-head list (module semantics)
    logits, off = [], 0
    for n in ACTION_NVEC:
        logits.append(out[:, off:off + n])
        off += n
    return logits


def init_params(key):
    """Deterministic PyTorch-style (uniform +-1/sqrt(fan_in)) initialization.

    Weights are stored pre-transposed as (in, out) so the kernel computes
    x @ W + b; the five head Linears are concatenated along the output axis.
    """
    def linear(key, fan_in, fan_out):
        k_w, k_b = jax.random.split(key)
        bound = 1.0 / jnp.sqrt(fan_in)
        w = jax.random.uniform(k_w, (fan_in, fan_out), jnp.float32, -bound, bound)
        b = jax.random.uniform(k_b, (1, fan_out), jnp.float32, -bound, bound)
        return w, b

    keys = jax.random.split(key, 2 + len(ACTION_NVEC))
    w1, b1 = linear(keys[0], OBS_DIM, HIDDEN)                # (32, 64), (1, 64)
    w2, b2 = linear(keys[1], HIDDEN, HIDDEN)                 # (64, 64), (1, 64)

    head_ws, head_bs = [], []
    for i, n in enumerate(ACTION_NVEC):
        w, b = linear(keys[2 + i], HIDDEN, n)
        head_ws.append(w)
        head_bs.append(b)
    wh = jnp.concatenate(head_ws, axis=1)                    # (64, 130)
    bh = jnp.concatenate(head_bs, axis=1)                    # (1,  130)
    return (w1, b1, w2, b2, wh, bh)


def reference_forward(x, params):
    """Pure-JAX reference of the PyTorch forward."""
    w1, b1, w2, b2, wh, bh = params
    h = jnp.maximum(x @ w1 + b1, 0.0)
    h = jnp.maximum(h @ w2 + b2, 0.0)
    out = h @ wh + bh
    logits, off = [], 0
    for n in ACTION_NVEC:
        logits.append(out[:, off:off + n])
        off += n
    return logits


def _check(B, key_x, params, atol):
    x = jax.random.normal(key_x, (B, OBS_DIM), jnp.float32)
    got = policy_forward(x, params)
    got = [jax.block_until_ready(g) for g in got]
    want = reference_forward(x, params)
    for g, w, n in zip(got, want, ACTION_NVEC):
        assert g.shape == (B, n), g.shape
        assert jnp.allclose(g, w, atol=atol, rtol=1e-5)


if __name__ == "__main__":
    key = jax.random.PRNGKey(0)
    k_x, k_p = jax.random.split(key)
    params = init_params(k_p)

    # small batch (single tile)
    _check(2, k_x, params, atol=1e-5)
    # non-tile-aligned medium batch (single tile, batch crop path)
    _check(300, jax.random.PRNGKey(1), params, atol=1e-4)
    # large batch exercising the multi-tile (even) grid path
    _check(2500, jax.random.PRNGKey(2), params, atol=1e-4)

    print("KERNEL_OK")
</pallas_src>

<mosaic_0001>
module attributes {stable_mosaic.version = 11 : i64} {
  func.func @policy_kernel(%arg0: i32, %arg1: memref<8x32xf32, #tpu.memory_space<vmem>>, %arg2: memref<32x64xf32, #tpu.memory_space<vmem>>, %arg3: memref<1x64xf32, #tpu.memory_space<vmem>>, %arg4: memref<64x64xf32, #tpu.memory_space<vmem>>, %arg5: memref<1x64xf32, #tpu.memory_space<vmem>>, %arg6: memref<64x130xf32, #tpu.memory_space<vmem>>, %arg7: memref<1x130xf32, #tpu.memory_space<vmem>>, %arg8: memref<8x130xf32, #tpu.memory_space<vmem>>) attributes {dimension_semantics = [#tpu.dimension_semantics<parallel>], iteration_bounds = array<i64: 1>, scalar_prefetch = 0 : i64, scratch_operands = 0 : i64, tpu.core_type = #tpu.core_type<tc>, window_params = [{transform_indices = @transform_0, window_bounds = array<i64: 8, 32>}, {pipeline_mode = #tpu.pipeline_mode<synchronous>, transform_indices = @transform_1, window_bounds = array<i64: 32, 64>}, {pipeline_mode = #tpu.pipeline_mode<synchronous>, transform_indices = @transform_2, window_bounds = array<i64: 1, 64>}, {pipeline_mode = #tpu.pipeline_mode<synchronous>, transform_indices = @transform_3, window_bounds = array<i64: 64, 64>}, {pipeline_mode = #tpu.pipeline_mode<synchronous>, transform_indices = @transform_4, window_bounds = array<i64: 1, 64>}, {pipeline_mode = #tpu.pipeline_mode<synchronous>, transform_indices = @transform_5, window_bounds = array<i64: 64, 130>}, {pipeline_mode = #tpu.pipeline_mode<synchronous>, transform_indices = @transform_6, window_bounds = array<i64: 1, 130>}, {transform_indices = @transform_7, window_bounds = array<i64: 8, 130>}]} {
    %c0 = arith.constant 0 : index
    %c0_0 = arith.constant 0 : index
    %0 = vector.load %arg1[%c0, %c0_0] : memref<8x32xf32, #tpu.memory_space<vmem>>, vector<8x32xf32>
    %c0_1 = arith.constant 0 : index
    %c0_2 = arith.constant 0 : index
    %1 = vector.load %arg2[%c0_1, %c0_2] : memref<32x64xf32, #tpu.memory_space<vmem>>, vector<32x64xf32>
    %cst = arith.constant dense<0.000000e+00> : vector<8x64xf32>
    %2 = tpu.matmul %0, %1, %cst {dimension_numbers = #tpu.dot_dimension_numbers<[1], [0], [0], [1], [0, 0, 1, 1], [], []>} : vector<8x32xf32>, vector<32x64xf32>, vector<8x64xf32> -> vector<8x64xf32>
    %c0_3 = arith.constant 0 : index
    %c0_4 = arith.constant 0 : index
    %3 = vector.load %arg3[%c0_3, %c0_4] : memref<1x64xf32, #tpu.memory_space<vmem>>, vector<1x64xf32>
    %4 = vector.broadcast %3 : vector<1x64xf32> to vector<8x64xf32>
    %5 = arith.addf %2, %4 : vector<8x64xf32>
    %cst_5 = arith.constant 0.000000e+00 : f32
    %6 = vector.broadcast %cst_5 : f32 to vector<8x64xf32>
    %7 = arith.maximumf %5, %6 : vector<8x64xf32>
    %c0_6 = arith.constant 0 : index
    %c0_7 = arith.constant 0 : index
    %8 = vector.load %arg4[%c0_6, %c0_7] : memref<64x64xf32, #tpu.memory_space<vmem>>, vector<64x64xf32>
    %cst_8 = arith.constant dense<0.000000e+00> : vector<8x64xf32>
    %9 = tpu.matmul %7, %8, %cst_8 {dimension_numbers = #tpu.dot_dimension_numbers<[1], [0], [0], [1], [0, 0, 1, 1], [], []>} : vector<8x64xf32>, vector<64x64xf32>, vector<8x64xf32> -> vector<8x64xf32>
    %c0_9 = arith.constant 0 : index
    %c0_10 = arith.constant 0 : index
    %10 = vector.load %arg5[%c0_9, %c0_10] : memref<1x64xf32, #tpu.memory_space<vmem>>, vector<1x64xf32>
    %11 = vector.broadcast %10 : vector<1x64xf32> to vector<8x64xf32>
    %12 = arith.addf %9, %11 : vector<8x64xf32>
    %cst_11 = arith.constant 0.000000e+00 : f32
    %13 = vector.broadcast %cst_11 : f32 to vector<8x64xf32>
    %14 = arith.maximumf %12, %13 : vector<8x64xf32>
    %c0_12 = arith.constant 0 : index
    %c0_13 = arith.constant 0 : index
    %15 = vector.load %arg6[%c0_12, %c0_13] : memref<64x130xf32, #tpu.memory_space<vmem>>, vector<64x130xf32>
    %cst_14 = arith.constant dense<0.000000e+00> : vector<8x130xf32>
    %16 = tpu.matmul %14, %15, %cst_14 {dimension_numbers = #tpu.dot_dimension_numbers<[1], [0], [0], [1], [0, 0, 1, 1], [], []>} : vector<8x64xf32>, vector<64x130xf32>, vector<8x130xf32> -> vector<8x130xf32>
    %c0_15 = arith.constant 0 : index
    %c0_16 = arith.constant 0 : index
    %17 = vector.load %arg7[%c0_15, %c0_16] : memref<1x130xf32, #tpu.memory_space<vmem>>, vector<1x130xf32>
    %18 = vector.broadcast %17 : vector<1x130xf32> to vector<8x130xf32>
    %19 = arith.addf %16, %18 : vector<8x130xf32>
    %c0_17 = arith.constant 0 : index
    %c0_18 = arith.constant 0 : index
    %20 = vector.load %arg8[%c0_17, %c0_18] : memref<8x130xf32, #tpu.memory_space<vmem>>, vector<8x130xf32>
    tpu.vector_store %arg8[%c0_17, %c0_18], %19 {strides = array<i32>} : memref<8x130xf32, #tpu.memory_space<vmem>>, vector<8x130xf32>,
    return
  }
  func.func @transform_0(%arg0: i32) -> (i32, i32) {
    %c0_i32 = arith.constant 0 : i32
    %c0_i32_0 = arith.constant 0 : i32
    return %arg0, %c0_i32 : i32, i32
  }
  func.func @transform_1(%arg0: i32) -> (i32, i32) {
    %c0_i32 = arith.constant 0 : i32
    %c0_i32_0 = arith.constant 0 : i32
    %c0_i32_1 = arith.constant 0 : i32
    return %c0_i32, %c0_i32_0 : i32, i32
  }
  func.func @transform_2(%arg0: i32) -> (i32, i32) {
    %c0_i32 = arith.constant 0 : i32
    %c0_i32_0 = arith.constant 0 : i32
    %c0_i32_1 = arith.constant 0 : i32
    return %c0_i32, %c0_i32_0 : i32, i32
  }
  func.func @transform_3(%arg0: i32) -> (i32, i32) {
    %c0_i32 = arith.constant 0 : i32
    %c0_i32_0 = arith.constant 0 : i32
    %c0_i32_1 = arith.constant 0 : i32
    return %c0_i32, %c0_i32_0 : i32, i32
  }
  func.func @transform_4(%arg0: i32) -> (i32, i32) {
    %c0_i32 = arith.constant 0 : i32
    %c0_i32_0 = arith.constant 0 : i32
    %c0_i32_1 = arith.constant 0 : i32
    return %c0_i32, %c0_i32_0 : i32, i32
  }
  func.func @transform_5(%arg0: i32) -> (i32, i32) {
    %c0_i32 = arith.constant 0 : i32
    %c0_i32_0 = arith.constant 0 : i32
    %c0_i32_1 = arith.constant 0 : i32
    return %c0_i32, %c0_i32_0 : i32, i32
  }
  func.func @transform_6(%arg0: i32) -> (i32, i32) {
    %c0_i32 = arith.constant 0 : i32
    %c0_i32_0 = arith.constant 0 : i32
    %c0_i32_1 = arith.constant 0 : i32
    return %c0_i32, %c0_i32_0 : i32, i32
  }
  func.func @transform_7(%arg0: i32) -> (i32, i32) {
    %c0_i32 = arith.constant 0 : i32
    %c0_i32_0 = arith.constant 0 : i32
    return %arg0, %c0_i32 : i32, i32
  }
}

</mosaic_0001>

<bundles_post_ra>
// kernel: policy_forward.1
= control target key start
LH: loop header
LB: loop body
LE: loop exit
PB: predicated region body
PF: predicated region fallthrough
CT: control target
= control target key end

     0   :  { %12 = vsyncpa [#allocation3], 0  ;;  %s384_s0 = inlined_call_operand.vmem [shape: f32[8,32], index: 0, kind: input, shape index: {}]   ;;  %s385_s1 = inlined_call_operand.hbm [shape: f32[32,64], index: 1, kind: input, shape index: {}]   ;;  %s386_s2 = inlined_call_operand.vmem [shape: f32[1,64], index: 2, kind: input, shape index: {}]   ;;  %s387_s3 = inlined_call_operand.hbm [shape: f32[64,64], index: 3, kind: input, shape index: {}]   ;;  %s388_s4 = inlined_call_operand.vmem [shape: f32[1,64], index: 4, kind: input, shape index: {}]   ;;  %s389_s5 = inlined_call_operand.hbm [shape: f32[64,130], index: 5, kind: input, shape index: {}]   ;;  %s390_s6 = inlined_call_operand.vmem [shape: f32[1,130], index: 6, kind: input, shape index: {}]   ;;  %s391_s7 = inlined_call_operand.vmem [shape: f32[8,130], index: 7, kind: output, shape index: {}]  }
   0x1   :  { %13 = vsyncpa [#allocation5], 0  ;;  %s35_s26 = sshll.u32 %s387_s3, 4  ;;  %s307_s27 = smov [#allocation4]   ;;  %s36_s26 = int_to_ptr.hbm [resolvable:$true] %s35_s26 }
   0x2   :  { %s37_s28 = sshll.u32 %s307_s27, 4  ;;  %s20_s8 = sshll.u32 %s385_s1, 4  ;;  %s38_s28 = int_to_ptr.vmem [resolvable:$true] %s37_s28  ;;  %s21_s8 = int_to_ptr.hbm [resolvable:$true] %s20_s8 }
   0x3   :  { %s308_s9 = smov 128   ;;  %s309_s10 = smov 8  }
   0x4   :  { %43 = dma.hbm_to_vmem [thread:$0]  %s36_s26, 1024, %s38_s28, [#allocation5], %s308_s9, %s308_s9, %s309_s10  }
   0x5   :  { %s310_s11 = smov [#allocation2]   ;;  %s50_s15 = sshll.u32 %s389_s5, 4  ;;  %s51_s15 = int_to_ptr.hbm [resolvable:$true] %s50_s15 }
   0x6   :  { %s22_s12 = sshll.u32 %s310_s11, 4  ;;  %s311_s3 = smov [#allocation6]   ;;  %s23_s12 = int_to_ptr.vmem [resolvable:$true] %s22_s12 }
   0x7   :  { %28 = dma.hbm_to_vmem [thread:$0]  %s21_s8, 512, %s23_s12, [#allocation3], %s308_s9, %s308_s9, %s309_s10  }
   0x8   :  { %s52_s16 = sshll.u32 %s311_s3, 4  ;;  %s312_s17 = smov 256   ;;  %s53_s16 = int_to_ptr.vmem [resolvable:$true] %s52_s16 }
   0x9   :  { %s313_s18 = smov 16  }
   0xa   :  { %58 = dma.hbm_to_vmem [thread:$0]  %s51_s15, 2048, %s53_s16, [#allocation5], %s312_s17, %s312_s17, %s313_s18  }
   0xb   :  { %303 = dma.done.wait [#allocation3], 512  }
   0xc   :  { %304 = vsyncadd [#allocation3], 4294966784 }
   0xd   :  { %305 = dma.done.wait [#allocation5], 3072  }
   0xe   :  { %306 = vsyncadd [#allocation5], 4294964224  ;;  %v77_v0 = vld [vmem:[#allocation2 + $0x18] sm:$0xff]  ;;  %v76_v1 = vld [vmem:[#allocation2 + $0x10] sm:$0xff]  ;;  %vm82_vm0 = vcmask 261120   ;;  %vm119_vm1 = vcmask 523264  }
   0xf   :  { %98 = vmatpush.msra.mxu0 %v77_v0  ;;  %v114_v2 = vld [vmem:[#allocation4 + $0x38] sm:$0xff]  ;;  %v75_v3 = vld [vmem:[#allocation2 + $0x8] sm:$0xff]  ;;  %v113_v4 = vld [vmem:[#allocation4 + $0x30] sm:$0xff]  ;;  %vm210_vm2 = vcmask 15360  }
  0x10   :  { %131 = vmatpush.msra.mxu1 %v114_v2  ;;  %v112_v5 = vld [vmem:[#allocation4 + $0x28] sm:$0xff]  ;;  %v74_v6 = vld [vmem:[#allocation2] sm:$0xff]  ;;  %v110_v9 = vld [vmem:[#allocation4 + $0x18] sm:$0xff] }
  0x11   :  { %99 = vmatpush.msra.mxu0 %v76_v1  ;;  %v73_v7 = vld [vmem:[%s384_s0] sm:$0xff]  ;;  %v109_v10 = vld [vmem:[#allocation4 + $0x10] sm:$0xff]  ;;  %v108_v11 = vld [vmem:[#allocation4 + $0x8] sm:$0xff] }
  0x12   :  { %132 = vmatpush.msra.mxu1 %v113_v4  ;;  %v111_v8 = vld [vmem:[#allocation4 + $0x20] sm:$0xff]  ;;  %v158_v13 = vld [vmem:[#allocation6 + $0x70] sm:$0xff]  ;;  %v159_v14 = vld [vmem:[#allocation6 + $0x78] sm:$0xff] }
  0x13   :  { %100 = vmatpush.msra.mxu0 %v75_v3  ;;  %v107_v12 = vld [vmem:[#allocation4] sm:$0xff]  ;;  %177 = vmatpush.msra.mxu2 %v158_v13  ;;  %v157_v16 = vld [vmem:[#allocation6 + $0x68] sm:$0xff]  ;;  %v154_v17 = vld [vmem:[#allocation6 + $0x50] sm:$0xff] }
  0x14   :  { %133 = vmatpush.msra.mxu1 %v112_v5  ;;  %v156_v15 = vld [vmem:[#allocation6 + $0x60] sm:$0xff]  ;;  %197 = vmatpush.msra.mxu3 %v159_v14  ;;  %v155_v18 = vld [vmem:[#allocation6 + $0x58] sm:$0xff]  ;;  %v153_v20 = vld [vmem:[#allocation6 + $0x48] sm:$0xff] }
  0x15   :  { %101 = vmatpush.msra.mxu0 %v74_v6  ;;  %178 = vmatpush.msra.mxu2 %v156_v15  ;;  %v152_v19 = vld [vmem:[#allocation6 + $0x40] sm:$0xff]  ;;  %v150_v21 = vld [vmem:[#allocation6 + $0x30] sm:$0xff]  ;;  %v151_v22 = vld [vmem:[#allocation6 + $0x38] sm:$0xff] }
  0x16   :  { %218 = vmatmul.msk.f32.vlgmr.msra.gmra.mxu0 %vm82_vm0, %v73_v7  ;;  %134 = vmatpush.msra.mxu1 %v111_v8  ;;  %v229_v23 = vld [vmem:[%s386_s2] ss:$0 sm:$0xff]  ;;  %v149_v28 = vld [vmem:[#allocation6 + $0x28] sm:$0xff]  ;;  %v146_v29 = vld [vmem:[#allocation6 + $0x10] sm:$0xff] }
  0x17   :  { %198 = vmatpush.msra.mxu3 %v157_v16  ;;  %179 = vmatpush.msra.mxu2 %v154_v17  ;;  %v148_v27 = vld [vmem:[#allocation6 + $0x20] sm:$0xff]  ;;  %v147_v30 = vld [vmem:[#allocation6 + $0x18] sm:$0xff]  ;;  %v145_v32 = vld [vmem:[#allocation6 + $0x8] sm:$0xff] }
  0x18   :  { %135 = vmatpush.msra.mxu1 %v110_v9  ;;  %v144_v31 = vld [vmem:[#allocation6] sm:$0xff] }
  0x19   :  { %199 = vmatpush.msra.mxu3 %v155_v18  ;;  %180 = vmatpush.msra.mxu2 %v152_v19  ;;  %v230_v33 = vld [vmem:[%s388_s4] ss:$0 sm:$0xff] }
  0x1a   :  { %136 = vmatpush.msra.mxu1 %v109_v10  ;;  %v160_v37 = vld [vmem:[%s390_s6] sm:$0x3] }
  0x1b   :  { %200 = vmatpush.msra.mxu3 %v153_v20  ;;  %181 = vmatpush.msra.mxu2 %v150_v21  ;;  %v162_v38 = vperm.slane %v160_v37, 0  ;;  %v163_v39 = vperm.slane %v160_v37, 1 }
  0x1c   :  { %137 = vmatpush.msra.mxu1 %v108_v11 }
  0x1d   :  { %201 = vmatpush.msra.mxu3 %v151_v22  ;;  %182 = vmatpush.msra.mxu2 %v148_v27 }
  0x1e   :  { %138 = vmatpush.msra.mxu1 %v107_v12 }
  0x1f   :  { %202 = vmatpush.msra.mxu3 %v149_v28  ;;  %183 = vmatpush.msra.mxu2 %v146_v29 }
  0x21   :  { %203 = vmatpush.msra.mxu3 %v147_v30  ;;  %184 = vmatpush.msra.mxu2 %v144_v31 }
  0x23   :  { %204 = vmatpush.msra.mxu3 %v145_v32 }
  0x93   :  { %v103_v24 = vpop.f32.mrf.mxu0 }
  0x94   :  { %v104_v25 = vadd.f32 %v229_v23, %v103_v24 }
  0x96   :  { %v106_v26 = vmax.f32 %v104_v25, 0.0 }
  0x98   :  { %219 = vmatmul.msk.f32.vlgmr.msra.gmra.mxu1 %vm119_vm1, %v106_v26 }
 0x115   :  { %v140_v34 = vpop.f32.mrf.mxu1 }
 0x116   :  { %v141_v35 = vadd.f32 %v230_v33, %v140_v34 }
 0x118   :  { %v143_v36 = vmax.f32 %v141_v35, 0.0 }
 0x11a   :  { %220 = vmatmul.msk.f32.vlgmr.msra.gmra.mxu2 %vm119_vm1, %v143_v36  ;;  %221 = vmatmul.msk.f32.vlgmr.msra.gmra.mxu3 %vm119_vm1, %v143_v36 }
 0x19d   :  { %v186_v40 = vpop.f32.mrf.mxu2  ;;  %v206_v41 = vpop.f32.mrf.mxu3 }
 0x19e   :  { %v187_v42 = vadd.f32 %v186_v40, %v162_v38  ;;  %v207_v43 = vadd.f32 %v206_v41, %v163_v39 }
 0x1a0   :  { %209 = vst [vmem:[%s391_s7] sm:$0xff] %v187_v42 }
 0x1a1   :  { %211 = vst.msk [vmem:[%s391_s7 + $0x8] sm:$0xff] %vm210_vm2, %v207_v43 }
 0x1a2   :  { %216 = vsyncpa [#allocation3], 1 }
 0x1a3   :  { %217 = vsyncpa [#allocation5], 1 }

</bundles_post_ra>
